<compile_context>
chip_gen: v5e
topology: v5e:2x2
jax: 0.10.0
libtpu: 0.0.40
codegen_flags: <defaults>
</compile_context>

<pallas_src>
import numpy as np

import jax
import jax.numpy as jnp
from jax.experimental import pallas as pl
from jax.experimental.pallas import tpu as pltpu


def _round_up(x, m):
    return (x + m - 1) // m * m


# ----------------------------------------------------------------------------
# Pallas kernel: the whole tree, one grid step per node (post-order)
# ----------------------------------------------------------------------------
def _make_tree_kernel(max_children, mem_dim):
    def kernel(cs_ref,            # SMEM: (num_nodes*max_children,) child step ids
               x_ref,             # VMEM: (num_slots, in_dim) node inputs, post-order
               wx4_ref,           # VMEM: (in_dim, 4*mem_dim)  [W_ioux | W_fx]
               wiouh_ref,         # VMEM: (mem_dim, 3*mem_dim)
               wfh_ref,           # VMEM: (mem_dim, mem_dim)
               bx4_ref,           # VMEM: (1, 4*mem_dim) all biases pre-folded
               out_ref):          # VMEM-resident output slab: (num_slots, 2*mem_dim) = [c | h]
        t = pl.program_id(0)

        @pl.when(t == 0)
        def _init():
            # zero the state slab once; row `num_nodes` stays the dummy zero child
            out_ref[...] = jnp.zeros_like(out_ref)

        # current node input row
        x = x_ref[pl.ds(t, 1), :]                                        # (1, in_dim)

        # gather children [c | h] rows from the resident output slab
        child_rows = [out_ref[pl.ds(cs_ref[t * max_children + k], 1), :]
                      for k in range(max_children)]
        child = jnp.concatenate(child_rows, axis=0)                      # (max_children, 2*mem_dim)
        child_c = child[:, :mem_dim]
        child_h = child[:, mem_dim:]

        ch_sum = jnp.sum(child_h, axis=0, keepdims=True)                 # (1, mem_dim)

        # fused x-side product: [iou_x | f_x] + all biases  (lane-dense 4*mem_dim)
        xw = jnp.dot(x, wx4_ref[...], preferred_element_type=jnp.float32) + bx4_ref[...]
        hh = jnp.dot(ch_sum, wiouh_ref[...], preferred_element_type=jnp.float32)
        iou = xw[:, :3 * mem_dim] + hh                                   # (1, 3*mem_dim)

        i = jax.nn.sigmoid(iou[:, :mem_dim])
        o = jax.nn.sigmoid(iou[:, mem_dim:2 * mem_dim])
        u = jnp.tanh(iou[:, 2 * mem_dim:])

        fx = xw[:, 3 * mem_dim:]                                         # (1, mem_dim), incl. b_fx + b_fh
        fh = jnp.dot(child_h, wfh_ref[...], preferred_element_type=jnp.float32)
        f = jax.nn.sigmoid(fh + fx)                                      # (max_children, mem_dim)

        c = i * u + jnp.sum(f * child_c, axis=0, keepdims=True)          # (1, mem_dim)
        h = o * jnp.tanh(c)                                              # (1, mem_dim)

        # lane-dense combined store of this node's state
        out_ref[pl.ds(t, 1), :] = jnp.concatenate([c, h], axis=-1)

    return kernel


def make_tree_forward(num_nodes, max_children, in_dim, mem_dim):
    """One pallas_call covering the whole tree; returns (c_all, h_all) per node."""
    num_slots = _round_up(num_nodes + 1, 8)   # +1 dummy zero row for missing children

    kernel = _make_tree_kernel(max_children, mem_dim)

    grid_spec = pltpu.PrefetchScalarGridSpec(
        num_scalar_prefetch=1,                # child-step table -> SMEM
        grid=(num_nodes,),
        in_specs=[
            # all inputs use constant block indices -> DMA'd once, VMEM-resident
            pl.BlockSpec((num_slots, in_dim), lambda t, cs: (0, 0)),       # x (post-order)
            pl.BlockSpec((in_dim, 4 * mem_dim), lambda t, cs: (0, 0)),     # [W_ioux | W_fx]
            pl.BlockSpec((mem_dim, 3 * mem_dim), lambda t, cs: (0, 0)),    # W_iouh
            pl.BlockSpec((mem_dim, mem_dim), lambda t, cs: (0, 0)),        # W_fh
            pl.BlockSpec((1, 4 * mem_dim), lambda t, cs: (0, 0)),          # fused bias
        ],
        out_specs=pl.BlockSpec((num_slots, 2 * mem_dim), lambda t, cs: (0, 0)),
    )

    pallas_fn = pl.pallas_call(
        kernel,
        out_shape=jax.ShapeDtypeStruct((num_slots, 2 * mem_dim), jnp.float32),
        grid_spec=grid_spec,
        compiler_params=pltpu.CompilerParams(
            # nodes depend on earlier grid steps (children) -> sequential axis
            dimension_semantics=("arbitrary",)),
    )

    @jax.jit
    def forward(child_steps, x_ordered, wx4, wiouh, wfh, bx4):
        out = pallas_fn(child_steps, x_ordered, wx4, wiouh, wfh, bx4)
        c_all = out[:num_nodes, :mem_dim]
        h_all = out[:num_nodes, mem_dim:]
        return c_all, h_all

    return forward, num_slots


# ----------------------------------------------------------------------------
# Host-side tree plumbing (schedule only; no per-node device work)
# ----------------------------------------------------------------------------
class Tree:
    def __init__(self, node_id, children=()):
        self.id = node_id
        self.children = list(children)
        self.num_children = len(self.children)
        self.state = None


def build_schedule(root):
    """Post-order node list + flat child-step table (padded with dummy index)."""
    order = []

    def visit(n):
        for c in n.children:
            visit(c)
        order.append(n)

    visit(root)
    num_nodes = len(order)
    step_of = {id(n): t for t, n in enumerate(order)}
    max_children = max(1, max(n.num_children for n in order))   # exact, no silent drop
    node_ids = np.array([n.id for n in order], dtype=np.int32)
    child_steps = np.full((num_nodes * max_children,), num_nodes, dtype=np.int32)
    for t, n in enumerate(order):
        for k, c in enumerate(n.children):
            child_steps[t * max_children + k] = step_of[id(c)]
    return order, node_ids, child_steps, max_children


def tree_summarize_forward(tree, inputs, params, in_dim, mem_dim):
    """Mirrors TreeSummarize.forward; returns (root_state, H list in call order)."""
    order, node_ids, child_steps, max_children = build_schedule(tree)
    num_nodes = len(order)

    forward, num_slots = make_tree_forward(num_nodes, max_children, in_dim, mem_dim)

    # fused x-side weight and fully folded biases
    wx4 = jnp.concatenate([params["w_ioux"], params["w_fx"]], axis=1)        # (in_dim, 4*mem)
    bx4 = jnp.concatenate([params["b_ioux"] + params["b_iouh"],
                           params["b_fx"] + params["b_fh"]], axis=1)          # (1, 4*mem)

    x_ordered = np.zeros((num_slots, in_dim), np.float32)
    x_ordered[:num_nodes] = np.asarray(inputs)[node_ids]
    x_ordered = jnp.asarray(x_ordered)

    c_all, h_all = forward(jnp.asarray(child_steps), x_ordered,
                           wx4, params["w_iouh"], params["w_fh"], bx4)

    # attach states back onto the tree; H is appended per node_forward call (post-order)
    H = []
    for t, node in enumerate(order):
        node.state = (c_all[t:t + 1], h_all[t:t + 1])
        H.append(h_all[t:t + 1])
    # NOTE: Dropout (self.drop) is defined in __init__ but never applied in the
    # PyTorch forward, so it is intentionally omitted here.
    return order[-1].state, H


# ----------------------------------------------------------------------------
# Pure-JAX reference (exact Torch semantics, no padding) for verification
# ----------------------------------------------------------------------------
def ref_node_forward(x_row, child_c, child_h, params):
    x = x_row.reshape(1, -1)
    mem_dim = params["w_fh"].shape[0]
    ch_sum = jnp.sum(child_h, axis=0, keepdims=True)
    iou = (x @ params["w_ioux"] + params["b_ioux"]
           + ch_sum @ params["w_iouh"] + params["b_iouh"])
    i = jax.nn.sigmoid(iou[:, :mem_dim])
    o = jax.nn.sigmoid(iou[:, mem_dim:2 * mem_dim])
    u = jnp.tanh(iou[:, 2 * mem_dim:])
    f = jax.nn.sigmoid(child_h @ params["w_fh"] + params["b_fh"]
                       + x @ params["w_fx"] + params["b_fx"])
    fc = f * child_c
    c = i * u + jnp.sum(fc, axis=0, keepdims=True)
    h = o * jnp.tanh(c)
    return c, h


def ref_forward(tree_spec, inputs, params, mem_dim, H):
    node_id, children = tree_spec
    states = [ref_forward(ch, inputs, params, mem_dim, H) for ch in children]
    if not children:
        child_c = jnp.zeros((1, mem_dim), jnp.float32)
        child_h = jnp.zeros((1, mem_dim), jnp.float32)
    else:
        child_c = jnp.concatenate([s[0] for s in states], axis=0)
        child_h = jnp.concatenate([s[1] for s in states], axis=0)
    c, h = ref_node_forward(inputs[node_id], child_c, child_h, params)
    H.append((node_id, h))
    return c, h


# ----------------------------------------------------------------------------
if __name__ == "__main__":
    in_dim, mem_dim = 32, 32
    num_nodes = 5

    key = jax.random.PRNGKey(0)
    keys = jax.random.split(key, 9)

    def init(k, shape, scale=0.1):
        return (scale * jax.random.normal(k, shape)).astype(jnp.float32)

    # torch Linear params, stored transposed:  y = x @ W + b
    params = {
        "w_ioux": init(keys[0], (in_dim, 3 * mem_dim)),
        "b_ioux": init(keys[1], (1, 3 * mem_dim)),
        "w_iouh": init(keys[2], (mem_dim, 3 * mem_dim)),
        "b_iouh": init(keys[3], (1, 3 * mem_dim)),
        "w_fx":   init(keys[4], (in_dim, mem_dim)),
        "b_fx":   init(keys[5], (1, mem_dim)),
        "w_fh":   init(keys[6], (mem_dim, mem_dim)),
        "b_fh":   init(keys[7], (1, mem_dim)),
    }

    inputs = init(keys[8], (num_nodes, in_dim), scale=1.0)

    # Small tree:   0
    #              / \
    #             1   2(leaf)
    #            / \
    #     (leaf)3   4(leaf)
    tree = Tree(0, [Tree(1, [Tree(3), Tree(4)]), Tree(2)])
    tree_spec = (0, [(1, [(3, []), (4, [])]), (2, [])])

    (c_root, h_root), H = tree_summarize_forward(tree, inputs, params, in_dim, mem_dim)
    c_root = jax.block_until_ready(c_root)
    h_root = jax.block_until_ready(h_root)

    H_ref = []
    c_ref, h_ref = ref_forward(tree_spec, inputs, params, mem_dim, H_ref)

    assert c_root.shape == (1, mem_dim) and h_root.shape == (1, mem_dim)
    assert jnp.allclose(c_root, c_ref, atol=1e-5, rtol=1e-5)
    assert jnp.allclose(h_root, h_ref, atol=1e-5, rtol=1e-5)

    # per-node h check (the module's self.H list; call order == post-order)
    ref_h_by_id = {nid: h for nid, h in H_ref}
    order, _, _, _ = build_schedule(tree)
    for t, node in enumerate(order):
        assert jnp.allclose(H[t], ref_h_by_id[node.id], atol=1e-5, rtol=1e-5)

    print("KERNEL_OK")
</pallas_src>

<mosaic_0001>
module attributes {stable_mosaic.version = 11 : i64} {
  func.func @kernel(%arg0: i32, %arg1: memref<10xi32, #tpu.memory_space<smem>>, %arg2: memref<8x32xf32, #tpu.memory_space<vmem>>, %arg3: memref<32x128xf32, #tpu.memory_space<vmem>>, %arg4: memref<32x96xf32, #tpu.memory_space<vmem>>, %arg5: memref<32x32xf32, #tpu.memory_space<vmem>>, %arg6: memref<1x128xf32, #tpu.memory_space<vmem>>, %arg7: memref<8x64xf32, #tpu.memory_space<vmem>>) attributes {dimension_semantics = [#tpu.dimension_semantics<arbitrary>], iteration_bounds = array<i64: 5>, scalar_prefetch = 1 : i64, scratch_operands = 0 : i64, tpu.core_type = #tpu.core_type<tc>, window_params = [{pipeline_mode = #tpu.pipeline_mode<synchronous>, transform_indices = @transform_0, window_bounds = array<i64: 8, 32>}, {pipeline_mode = #tpu.pipeline_mode<synchronous>, transform_indices = @transform_1, window_bounds = array<i64: 32, 128>}, {pipeline_mode = #tpu.pipeline_mode<synchronous>, transform_indices = @transform_2, window_bounds = array<i64: 32, 96>}, {pipeline_mode = #tpu.pipeline_mode<synchronous>, transform_indices = @transform_3, window_bounds = array<i64: 32, 32>}, {pipeline_mode = #tpu.pipeline_mode<synchronous>, transform_indices = @transform_4, window_bounds = array<i64: 1, 128>}, {pipeline_mode = #tpu.pipeline_mode<synchronous>, transform_indices = @transform_5, window_bounds = array<i64: 8, 64>}]} {
    %c0_i32 = arith.constant 0 : i32
    %0 = arith.cmpi eq, %arg0, %c0_i32 : i32
    %1 = arith.extui %0 : i1 to i32
    %c0_i32_0 = arith.constant 0 : i32
    %2 = arith.cmpi ne, %1, %c0_i32_0 : i32
    scf.if %2 {
      %cst_21 = arith.constant 0.000000e+00 : f32
      %64 = vector.broadcast %cst_21 : f32 to vector<8x64xf32>
      %c0_22 = arith.constant 0 : index
      %c0_23 = arith.constant 0 : index
      %65 = vector.load %arg7[%c0_22, %c0_23] : memref<8x64xf32, #tpu.memory_space<vmem>>, vector<8x64xf32>
      tpu.vector_store %arg7[%c0_22, %c0_23], %64 {strides = array<i32>} : memref<8x64xf32, #tpu.memory_space<vmem>>, vector<8x64xf32>,
    } else {
    }
    %3 = arith.index_cast %arg0 : i32 to index
    %c0 = arith.constant 0 : index
    %4 = vector.load %arg2[%3, %c0] : memref<8x32xf32, #tpu.memory_space<vmem>>, vector<1x32xf32>
    %c2_i32 = arith.constant 2 : i32
    %5 = arith.muli %arg0, %c2_i32 : i32
    %c0_i32_1 = arith.constant 0 : i32
    %6 = arith.addi %5, %c0_i32_1 : i32
    %7 = arith.index_cast %6 : i32 to index
    %8 = memref.load %arg1[%7] : memref<10xi32, #tpu.memory_space<smem>>
    %9 = arith.index_cast %8 : i32 to index
    %c0_2 = arith.constant 0 : index
    %10 = vector.load %arg7[%9, %c0_2] : memref<8x64xf32, #tpu.memory_space<vmem>>, vector<1x64xf32>
    %c2_i32_3 = arith.constant 2 : i32
    %11 = arith.muli %arg0, %c2_i32_3 : i32
    %c1_i32 = arith.constant 1 : i32
    %12 = arith.addi %11, %c1_i32 : i32
    %13 = arith.index_cast %12 : i32 to index
    %14 = memref.load %arg1[%13] : memref<10xi32, #tpu.memory_space<smem>>
    %15 = arith.index_cast %14 : i32 to index
    %c0_4 = arith.constant 0 : index
    %16 = vector.load %arg7[%15, %c0_4] : memref<8x64xf32, #tpu.memory_space<vmem>>, vector<1x64xf32>
    %17 = tpu.concatenate %10, %16 in 0 : vector<1x64xf32>, vector<1x64xf32> -> vector<2x64xf32>
    %18 = vector.extract_strided_slice %17 {offsets = [0, 0], sizes = [2, 32], strides = [1, 1]} : vector<2x64xf32> to vector<2x32xf32>
    %19 = vector.extract_strided_slice %17 {offsets = [0, 32], sizes = [2, 32], strides = [1, 1]} : vector<2x64xf32> to vector<2x32xf32>
    %cst = arith.constant dense<0.000000e+00> : vector<32xf32>
    %20 = vector.multi_reduction <add>, %19, %cst [0] : vector<2x32xf32> to vector<32xf32>
    %21 = vector.shape_cast %20 : vector<32xf32> to vector<1x32xf32>
    %c0_5 = arith.constant 0 : index
    %c0_6 = arith.constant 0 : index
    %22 = vector.load %arg3[%c0_5, %c0_6] : memref<32x128xf32, #tpu.memory_space<vmem>>, vector<32x128xf32>
    %cst_7 = arith.constant dense<0.000000e+00> : vector<1x128xf32>
    %23 = tpu.matmul %4, %22, %cst_7 {dimension_numbers = #tpu.dot_dimension_numbers<[1], [0], [0], [1], [0, 0, 1, 1], [], []>} : vector<1x32xf32>, vector<32x128xf32>, vector<1x128xf32> -> vector<1x128xf32>
    %c0_8 = arith.constant 0 : index
    %c0_9 = arith.constant 0 : index
    %24 = vector.load %arg6[%c0_8, %c0_9] : memref<1x128xf32, #tpu.memory_space<vmem>>, vector<1x128xf32>
    %25 = arith.addf %23, %24 : vector<1x128xf32>
    %c0_10 = arith.constant 0 : index
    %c0_11 = arith.constant 0 : index
    %26 = vector.load %arg4[%c0_10, %c0_11] : memref<32x96xf32, #tpu.memory_space<vmem>>, vector<32x96xf32>
    %cst_12 = arith.constant dense<0.000000e+00> : vector<1x96xf32>
    %27 = tpu.matmul %21, %26, %cst_12 {dimension_numbers = #tpu.dot_dimension_numbers<[1], [0], [0], [1], [0, 0, 1, 1], [], []>} : vector<1x32xf32>, vector<32x96xf32>, vector<1x96xf32> -> vector<1x96xf32>
    %28 = vector.extract_strided_slice %25 {offsets = [0, 0], sizes = [1, 96], strides = [1, 1]} : vector<1x128xf32> to vector<1x96xf32>
    %29 = arith.addf %28, %27 : vector<1x96xf32>
    %30 = vector.extract_strided_slice %29 {offsets = [0, 0], sizes = [1, 32], strides = [1, 1]} : vector<1x96xf32> to vector<1x32xf32>
    %31 = arith.negf %30 : vector<1x32xf32>
    %32 = math.exp %31 : vector<1x32xf32>
    %cst_13 = arith.constant 1.000000e+00 : f32
    %33 = vector.broadcast %cst_13 : f32 to vector<1x32xf32>
    %34 = arith.addf %33, %32 : vector<1x32xf32>
    %35 = arith.divf %33, %34 : vector<1x32xf32>
    %36 = vector.extract_strided_slice %29 {offsets = [0, 32], sizes = [1, 32], strides = [1, 1]} : vector<1x96xf32> to vector<1x32xf32>
    %37 = arith.negf %36 : vector<1x32xf32>
    %38 = math.exp %37 : vector<1x32xf32>
    %cst_14 = arith.constant 1.000000e+00 : f32
    %39 = vector.broadcast %cst_14 : f32 to vector<1x32xf32>
    %40 = arith.addf %39, %38 : vector<1x32xf32>
    %41 = arith.divf %39, %40 : vector<1x32xf32>
    %42 = vector.extract_strided_slice %29 {offsets = [0, 64], sizes = [1, 32], strides = [1, 1]} : vector<1x96xf32> to vector<1x32xf32>
    %43 = math.tanh %42 : vector<1x32xf32>
    %44 = vector.extract_strided_slice %25 {offsets = [0, 96], sizes = [1, 32], strides = [1, 1]} : vector<1x128xf32> to vector<1x32xf32>
    %c0_15 = arith.constant 0 : index
    %c0_16 = arith.constant 0 : index
    %45 = vector.load %arg5[%c0_15, %c0_16] : memref<32x32xf32, #tpu.memory_space<vmem>>, vector<32x32xf32>
    %cst_17 = arith.constant dense<0.000000e+00> : vector<2x32xf32>
    %46 = tpu.matmul %19, %45, %cst_17 {dimension_numbers = #tpu.dot_dimension_numbers<[1], [0], [0], [1], [0, 0, 1, 1], [], []>} : vector<2x32xf32>, vector<32x32xf32>, vector<2x32xf32> -> vector<2x32xf32>
    %47 = vector.broadcast %44 : vector<1x32xf32> to vector<2x32xf32>
    %48 = arith.addf %46, %47 : vector<2x32xf32>
    %49 = arith.negf %48 : vector<2x32xf32>
    %50 = math.exp %49 : vector<2x32xf32>
    %cst_18 = arith.constant 1.000000e+00 : f32
    %51 = vector.broadcast %cst_18 : f32 to vector<2x32xf32>
    %52 = arith.addf %51, %50 : vector<2x32xf32>
    %53 = arith.divf %51, %52 : vector<2x32xf32>
    %54 = arith.mulf %35, %43 : vector<1x32xf32>
    %55 = arith.mulf %53, %18 : vector<2x32xf32>
    %cst_19 = arith.constant dense<0.000000e+00> : vector<32xf32>
    %56 = vector.multi_reduction <add>, %55, %cst_19 [0] : vector<2x32xf32> to vector<32xf32>
    %57 = vector.shape_cast %56 : vector<32xf32> to vector<1x32xf32>
    %58 = arith.addf %54, %57 : vector<1x32xf32>
    %59 = math.tanh %58 : vector<1x32xf32>
    %60 = arith.mulf %41, %59 : vector<1x32xf32>
    %61 = tpu.concatenate %58, %60 in 1 : vector<1x32xf32>, vector<1x32xf32> -> vector<1x64xf32>
    %62 = arith.index_cast %arg0 : i32 to index
    %c0_20 = arith.constant 0 : index
    %63 = vector.load %arg7[%62, %c0_20] : memref<8x64xf32, #tpu.memory_space<vmem>>, vector<1x64xf32>
    tpu.vector_store %arg7[%62, %c0_20], %61 {strides = array<i32>} : memref<8x64xf32, #tpu.memory_space<vmem>>, vector<1x64xf32>,
    return
  }
  func.func @transform_0(%arg0: i32, %arg1: memref<10xi32, #tpu.memory_space<smem>>) -> (i32, i32) {
    %c0_i32 = arith.constant 0 : i32
    %c0_i32_0 = arith.constant 0 : i32
    %c0_i32_1 = arith.constant 0 : i32
    return %c0_i32, %c0_i32_0 : i32, i32
  }
  func.func @transform_1(%arg0: i32, %arg1: memref<10xi32, #tpu.memory_space<smem>>) -> (i32, i32) {
    %c0_i32 = arith.constant 0 : i32
    %c0_i32_0 = arith.constant 0 : i32
    %c0_i32_1 = arith.constant 0 : i32
    return %c0_i32, %c0_i32_0 : i32, i32
  }
  func.func @transform_2(%arg0: i32, %arg1: memref<10xi32, #tpu.memory_space<smem>>) -> (i32, i32) {
    %c0_i32 = arith.constant 0 : i32
    %c0_i32_0 = arith.constant 0 : i32
    %c0_i32_1 = arith.constant 0 : i32
    return %c0_i32, %c0_i32_0 : i32, i32
  }
  func.func @transform_3(%arg0: i32, %arg1: memref<10xi32, #tpu.memory_space<smem>>) -> (i32, i32) {
    %c0_i32 = arith.constant 0 : i32
    %c0_i32_0 = arith.constant 0 : i32
    %c0_i32_1 = arith.constant 0 : i32
    return %c0_i32, %c0_i32_0 : i32, i32
  }
  func.func @transform_4(%arg0: i32, %arg1: memref<10xi32, #tpu.memory_space<smem>>) -> (i32, i32) {
    %c0_i32 = arith.constant 0 : i32
    %c0_i32_0 = arith.constant 0 : i32
    %c0_i32_1 = arith.constant 0 : i32
    return %c0_i32, %c0_i32_0 : i32, i32
  }
  func.func @transform_5(%arg0: i32, %arg1: memref<10xi32, #tpu.memory_space<smem>>) -> (i32, i32) {
    %c0_i32 = arith.constant 0 : i32
    %c0_i32_0 = arith.constant 0 : i32
    %c0_i32_1 = arith.constant 0 : i32
    return %c0_i32, %c0_i32_0 : i32, i32
  }
}

</mosaic_0001>

<bundles_post_ra>
// kernel: forward.1
= control target key start
LH: loop header
LB: loop body
LE: loop exit
PB: predicated region body
PF: predicated region fallthrough
CT: control target
= control target key end

     0   :  { %s757_s24 = smov [#allocation3]   ;;  %s893_s0 = inlined_call_operand.hbm [shape: s32[10], index: 0, kind: input, shape index: {}]   ;;  %s894_s1 = inlined_call_operand.hbm [shape: f32[8,32], index: 1, kind: input, shape index: {}]   ;;  %s895_s2 = inlined_call_operand.hbm [shape: f32[32,128], index: 2, kind: input, shape index: {}]   ;;  %s896_s3 = inlined_call_operand.hbm [shape: f32[32,96], index: 3, kind: input, shape index: {}]   ;;  %s897_s4 = inlined_call_operand.hbm [shape: f32[32,32], index: 4, kind: input, shape index: {}]   ;;  %s898_s5 = inlined_call_operand.vmem [shape: f32[1,128], index: 5, kind: input, shape index: {}]   ;;  %s899_s6 = inlined_call_operand.vmem [shape: f32[8,64], index: 6, kind: output, shape index: {}]  }
   0x1   :  { %s12_s23 = sshll.u32 %s893_s0, 4  ;;  %s13_s23 = int_to_ptr.hbm [resolvable:$true] %s12_s23 }
   0x2   :  { %15 = dma.hbm_to_smem %s13_s23, 16, %s757_s24, [#allocation2] }
   0x3   :  { %739 = dma.done.wait [#allocation2], 16 }
   0x4   :  { %740 = vsyncadd [#allocation2], 4294967280 }
   0x5   :  { %18 = sfence }
   0x6   :  { %19 = vsyncpa [#allocation5], 0 }
   0x7   :  { %20 = vsyncpa [#allocation7], 0 }
   0x8   :  { %21 = vsyncpa [#allocation10], 0  ;;  %s806_s25 = smov 0  }
   0x9 LB: > { %s181_s0 = sshll.u32 %s895_s2, 4  ;;  %s815_s28 = sadd.s32 4294967295, %s755_s25   ;;  %s755_s25 = sphi %s806_s25, %s27_s25   ;;  %s182_s0 = int_to_ptr.hbm [resolvable:$true] %s181_s0 }
   0xa   : > { %p512_p0 = scmp.ge.s32.totalorder %s755_s25, 1  ;;  %p158_p1 = scmp.lt.s32.totalorder %s755_s25, 6 }
   0xb   : > { %p513_p2 = scmp.ne.s32.totalorder %s815_s28, 0  ;;  %p564_p3 = scmp.eq.s32.totalorder %s815_s28, 0 }
   0xc   : > { %p821_p4 = pnand %p512_p0, %p158_p1  ;;  %s758_s30 = smov [#allocation6]  }
   0xd   : > { %s183_s7 = sshll.u32 %s758_s30, 4  ;;  %s170_s10 = sshll.u32 %s894_s1, 4  ;;  %s184_s7 = int_to_ptr.vmem [resolvable:$true] %s183_s7  ;;  %s171_s10 = int_to_ptr.hbm [resolvable:$true] %s170_s10 }
   0xe   : > { %p551_p5 = pneg %p821_p4  ;;  %s759_s12 = smov [#allocation4]  }
   0xf   : > { %s172_s13 = sshll.u32 %s759_s12, 4  ;;  %s195_s16 = sshll.u32 %s896_s3, 4  ;;  %s173_s13 = int_to_ptr.vmem [resolvable:$true] %s172_s13  ;;  %s196_s16 = int_to_ptr.hbm [resolvable:$true] %s195_s16 }
  0x10   : > { %p832_p6 = pnand %p564_p3, %p551_p5  ;;  %s760_s17 = smov 128  }
  0x11   : > { %s761_s18 = smov 8   ;;  %s762_s19 = smov [#allocation8]  }
  0x12   : > { %557 = dma.hbm_to_vmem [thread:$0]  (!%p832_p6), %s182_s0, 512, %s184_s7, [#allocation7], %s760_s17, %s760_s17, %s761_s18  }
  0x13   : > { %554 = dma.hbm_to_vmem [thread:$0]  (!%p832_p6), %s171_s10, 128, %s173_s13, [#allocation5]  }
  0x14   : > { %s197_s20 = sshll.u32 %s762_s19, 4  ;;  %s209_s23 = sshll.u32 %s897_s4, 4  ;;  %s198_s20 = int_to_ptr.vmem [resolvable:$true] %s197_s20  ;;  %s210_s23 = int_to_ptr.hbm [resolvable:$true] %s209_s23 }
  0x15   : > { %560 = dma.hbm_to_vmem [thread:$0]  (!%p832_p6), %s196_s16, 512, %s198_s20, [#allocation7], %s760_s17, %s760_s17, %s761_s18  }
  0x16   : > { %s763_s24 = smov [#allocation9]   ;;  %230 = sbr.rel (%p821_p4) target bundleno = 536 (0x218), region = 40 }
  0x17   : > { %s211_s26 = sshll.u32 %s763_s24, 4  ;;  %s212_s26 = int_to_ptr.vmem [resolvable:$true] %s211_s26 }
  0x18   : > { %563 = dma.hbm_to_vmem [thread:$0]  (!%p832_p6), %s210_s23, 512, %s212_s26, [#allocation10], %s760_s17, %s760_s17, %s761_s18  }
  0x1b   : > { %742 = dma.done.wait (%p564_p3), [#allocation5], 128  }
  0x1c   : > { %744 = vsyncadd (%p564_p3), [#allocation5], 4294967168 }
  0x1d   : > { %746 = dma.done.wait (%p564_p3), [#allocation7], 1024  }
  0x1e   : > { %748 = vsyncadd (%p564_p3), [#allocation7], 4294966272 }
  0x1f   : > { %750 = dma.done.wait (%p564_p3), [#allocation10], 512  }
  0x20   : > { %752 = vsyncadd (%p564_p3), [#allocation10], 4294966784  ;;  %267 = sbr.rel (%p513_p2) target bundleno = 39 (0x27), region = 60 }
  0x25   : > { %vm268_vm0 = vcmask 523264   ;;  %v764_v0 = vmov 0.0  }
  0x26   : > { %269 = vst.msk [vmem:[%s899_s6] sm:$0xff] %vm268_vm0, %v764_v0 }
  0x27 PF: > { %v296_v1 = vld [vmem:[#allocation6 + $0x18] sm:$0xff]  ;;  %v295_v2 = vld [vmem:[#allocation6 + $0x10] sm:$0xff]  ;;  %s524_s29 = sshll.u32 %s815_s28, 1  ;;  %v294_v5 = vld [vmem:[#allocation6 + $0x8] sm:$0xff]  ;;  %s532_s9 = scalar_lea.vmem [#allocation4], %s755_s25  ;;  %vm298_vm1 = vcmask 261120  }
  0x28   : > { %314 = vmatpush.msra.mxu0 %v296_v1  ;;  %s273_s30 = sld [smem:[#allocation3 + %s524_s29]]  ;;  %s276_s7 = sadd.s32 1, %s524_s29  ;;  %v375_v3 = vld [vmem:[#allocation9 + $0x18] sm:$0xff]  ;;  %v374_v4 = vld [vmem:[#allocation9 + $0x10] sm:$0xff]  ;;  %v373_v6 = vld [vmem:[#allocation9 + $0x8] sm:$0xff]  ;;  %vm283_vm2 = vcmask 1040384  }
  0x29   : > { %s277_s8 = sld [smem:[#allocation3 + %s276_s7]]  ;;  %398 = vmatpush.msra.mxu2 %v375_v3  ;;  %v293_v7 = vld [vmem:[#allocation6] sm:$0xff]  ;;  %v534_v8 = vld [vmem:[%s532_s9 - $0x1] sm:$0x1]  ;;  %vm285_vm3 = vcmask 517376   ;;  %s765_s16 = smov 96  }
  0x2a   : > { %315 = vmatpush.msra.mxu0 %v295_v2  ;;  %v372_v9 = vld [vmem:[#allocation9] sm:$0xff]  ;;  %v325_v21 = vld [vmem:[#allocation8 + $0x18] sm:$0xff]  ;;  %v324_v22 = vld [vmem:[#allocation8 + $0x10] sm:$0xff]  ;;  %s766_s19 = smov 32   ;;  %s767_s20 = smov 64   ;;  %vm431_vm8 = vcmask 254976  }
  0x2b   : > { %399 = vmatpush.msra.mxu2 %v374_v4  ;;  %343 = vmatpush.msra.mxu1 %v325_v21  ;;  %v323_v23 = vld [vmem:[#allocation8 + $0x8] sm:$0xff]  ;;  %v322_v24 = vld [vmem:[#allocation8] sm:$0xff]  ;;  %v297_v26 = vld [vmem:[%s898_s5] sm:$0x1]  ;;  %s447_s23 = scalar_lea.vmem %s899_s6, %s815_s28  ;;  %vm448_vm13 = vcmask 516096  }
  0x2c   : > { %316 = vmatpush.msra.mxu0 %v294_v5 }
  0x2d   : > { %400 = vmatpush.msra.mxu2 %v373_v6  ;;  %344 = vmatpush.msra.mxu1 %v324_v22 }
  0x2e   : > { %s274_s12 = scalar_lea.vmem %s899_s6, %s273_s30  ;;  %317 = vmatpush.msra.mxu0 %v293_v7 }
  0x2f   : > { %s278_s15 = scalar_lea.vmem %s899_s6, %s277_s8  ;;  %525 = vmatmul.msk.f32.vlgmr.msra.gmra.mxu0 %vm298_vm1, %v534_v8  ;;  %401 = vmatpush.msra.mxu2 %v372_v9  ;;  %v275_v10 = vld [vmem:[%s274_s12] sm:$0x1] }
  0x30   : > { %v279_v11 = vld [vmem:[%s278_s15] sm:$0x1]  ;;  %345 = vmatpush.msra.mxu1 %v323_v23 }
  0x31   : > { %v281_v12 = vrot.slane %v279_v11, 7 }
  0x32   : > { %346 = vmatpush.msra.mxu1 %v322_v24 }
  0x33   : > { %v284_v13 = vsel %vm283_vm2, %v275_v10, %v281_v12 }
  0x34   : > { %378 = vrot.lane.b32.xlu0 %v284_v13, %s765_s16  ;;  %v286_v14 = vsel %vm285_vm3, %v284_v13, 0.0 }
  0x35   : > { %v287_v15 = vrot.slane %v286_v14, 4 }
  0x37   : > { %v288_v16 = vadd.f32 %v287_v15, %v286_v14 }
  0x39   : > { %v289_v17 = vrot.slane %v288_v16, 2 }
  0x3b   : > { %v290_v18 = vadd.f32 %v289_v17, %v288_v16 }
  0x3d   : > { %v291_v19 = vrot.slane %v290_v18, 1 }
  0x3f   : > { %v292_v20 = vadd.f32 %v291_v19, %v290_v18 }
  0x41   : > { %327 = vrot.lane.b32.xlu0 %v292_v20, %s765_s16 }
  0xa6   : > { %v379_v25 = vpop.permute.xlu0 %378 }
  0xa7   : > { %528 = vmatmul.msk.f32.vlgmr.msra.gmra.mxu2 %vm298_vm1, %v379_v25 }
  0xac   : > { %v319_v27 = vpop.f32.mrf.mxu0 }
  0xad   : > { %v320_v28 = vadd.f32 %v319_v27, %v297_v26 }
  0xaf   : > { %v376_v29 = vperm.slane %v320_v28, 0 }
  0xb1   : > { %381 = vrot.lane.b32.xlu1 %v376_v29, %s766_s19 }
  0xb3   : > { %v328_v30 = vpop.permute.xlu0 %327 }
  0xb4   : > { %526 = vmatmul.msk.f32.vlgmr.msra.gmra.mxu1 %vm298_vm1, %v328_v30 }
 0x123   : > { %v382_v35 = vpop.permute.xlu1 %381 }
 0x12a   : > { %v403_v34 = vpop.f32.mrf.mxu2 }
 0x12b   : > { %v404_v36 = vadd.f32 %v403_v34, %v382_v35 }
 0x12d   : > { %v529_v37 = vmul.f32 -1.442695, %v404_v36 }
 0x131   : > { %v348_v31 = vpop.f32.mrf.mxu1 }
 0x132   : > { %v351_v32 = vadd.f32 %v348_v31, %v320_v28 }
 0x134   : > { %591 = vtanh.f32 %v351_v32  ;;  %v527_v42 = vmul.f32 -1.442695, %v351_v32 }
 0x135   : > { %593 = vpow2.f32 %v529_v37 }
 0x13a   : > { %v592_v33 = vpop.eup %591 }
 0x13b   : > { %426 = vrot.lane.b32.xlu1 %v592_v33, %s767_s20  ;;  %v594_v38 = vpop.eup %593 }
 0x13c   : > { %v409_v39 = vadd.f32 1.0, %v594_v38 }
 0x13e   : > { %595 = vrcp.f32 %v409_v39  ;;  %v421_v47 = vand.u32 2147483648, %v409_v39  ;;  %vm415_vm5 = vweird.f32 %v409_v39  ;;  %v419_v48 = vand.u32 2147483647, %v409_v39 }
 0x13f   : > { %597 = vpow2.f32 %v527_v42 }
 0x140   : > { %v422_v51 = vor.u32 1.1754944e-38, %v421_v47  ;;  %vm420_vm7 = vcmp.eq.f32.partialorder %v419_v48, 8.507059e+37 }
 0x144   : > { %v596_v40 = vpop.eup %595 }
 0x145   : > { %v411_v41 = vmul.f32 %v596_v40, %v409_v39  ;;  %vm416_vm4 = vweird.f32 %v596_v40  ;;  %v598_v46 = vpop.eup %597 }
 0x146   : > { %vm417_vm6 = vmor %vm415_vm5, %vm416_vm4  ;;  %v355_v49 = vadd.f32 1.0, %v598_v46 }
 0x147   : > { %v412_v43 = vsub.f32 1.0, %v411_v41 }
 0x148   : > { %599 = vrcp.f32 %v355_v49  ;;  %v367_v0 = vand.u32 2147483648, %v355_v49  ;;  %vm361_vm10 = vweird.f32 %v355_v49  ;;  %v365_v1 = vand.u32 2147483647, %v355_v49 }
 0x149   : > { %v413_v44 = vmul.f32 %v596_v40, %v412_v43 }
 0x14a   : > { %v368_v4 = vor.u32 1.1754944e-38, %v367_v0  ;;  %vm366_vm12 = vcmp.eq.f32.partialorder %v365_v1, 8.507059e+37 }
 0x14b   : > { %v414_v45 = vadd.f32 %v596_v40, %v413_v44 }
 0x14d   : > { %v418_v50 = vsel %vm417_vm6, %v596_v40, %v414_v45 }
 0x14e   : > { %v423_v52 = vsel %vm420_vm7, %v422_v51, %v418_v50  ;;  %v600_v54 = vpop.eup %599 }
 0x14f   : > { %v430_v53 = vmul.f32 %v423_v52, %v284_v13  ;;  %v357_v57 = vmul.f32 %v600_v54, %v355_v49  ;;  %vm362_vm9 = vweird.f32 %v600_v54 }
 0x150   : > { %vm363_vm11 = vmor %vm361_vm10, %vm362_vm9 }
 0x151   : > { %v432_v55 = vsel %vm431_vm8, %v430_v53, 0.0  ;;  %v358_v59 = vsub.f32 1.0, %v357_v57 }
 0x152   : > { %v433_v56 = vrot.slane %v432_v55, 4 }
 0x153   : > { %v359_v61 = vmul.f32 %v600_v54, %v358_v59 }
 0x154   : > { %v434_v58 = vadd.f32 %v433_v56, %v432_v55 }
 0x155   : > { %v360_v63 = vadd.f32 %v600_v54, %v359_v61 }
 0x156   : > { %v435_v60 = vrot.slane %v434_v58, 2 }
 0x157   : > { %v364_v3 = vsel %vm363_vm11, %v600_v54, %v360_v63 }
 0x158   : > { %v436_v62 = vadd.f32 %v435_v60, %v434_v58  ;;  %v369_v6 = vsel %vm366_vm12, %v368_v4, %v364_v3 }
 0x15a   : > { %v437_v2 = vrot.slane %v436_v62, 1 }
 0x15c   : > { %v438_v7 = vadd.f32 %v437_v2, %v436_v62 }
 0x1ad   : > { %v427_v5 = vpop.permute.xlu1 %426 }
 0x1ae   : > { %v429_v8 = vmul.f32 %v427_v5, %v369_v6 }
 0x1b0   : > { %v439_v9 = vadd.f32 %v438_v7, %v429_v8 }
 0x1b2   : > { %601 = vtanh.f32 %v439_v9 }
 0x1b8   : > { %v602_v10 = vpop.eup %601 }
 0x1b9   : > { %442 = vrot.lane.b32.xlu2 %v602_v10, %s766_s19 }
 0x213   : > { %v443_v11 = vpop.permute.xlu2 %442 }
 0x214   : > { %v445_v12 = vmul.f32 %v443_v11, %v369_v6 }
 0x216   : > { %v446_v13 = vsel %vm298_vm1, %v439_v9, %v445_v12 }
 0x217   : > { %449 = vst.msk [vmem:[%s447_s23] sm:$0x1] %vm448_vm13, %v446_v13 }
 0x218 PF: > { %s27_s25 = sadd.s32 1, %s755_s25  }
 0x219   : > { %p24_p7 = scmp.ge.s32.totalorder %s27_s25, 7  }
 0x21b   :  { %26 = sbr.rel (!%p24_p7) target bundleno = 9 (0x9), region = 88 }
 0x220   :  { %461 = vsyncpa [#allocation5], 1 }
 0x221   :  { %463 = vsyncpa [#allocation5 + $0x1], 1 }
 0x222   :  { %464 = vsyncpa [#allocation7], 1 }
 0x223   :  { %465 = vsyncpa [#allocation10], 1 }

</bundles_post_ra>
